<compile_context>
chip_gen: v7x
topology: tpu7x:2x2x1
jax: 0.10.0
libtpu: 0.0.40
codegen_flags: <defaults>
</compile_context>

<pallas_src>
import math
import functools

import jax
import jax.numpy as jnp
from jax.experimental import pallas as pl
from jax.experimental.pallas import tpu as pltpu

# ---- module hyperparameters (small, consistent with ndt1) ----
B = 2            # batch
T = 8            # sequence length
H = 32           # hidden_size
F_OUT = 16       # config.size   (config.active = True)
ACT = "relu"     # config.act


def _gelu_tanh(x):
    # tanh-approx GELU (EUP-friendly).  TODO(synk): exact erf GELU if config.act
    # demands it; ndt1 configs typically use relu/gelu where this is sufficient.
    c = math.sqrt(2.0 / math.pi)
    return 0.5 * x * (1.0 + jnp.tanh(c * (x + 0.044715 * x * x * x)))


_ACT2FN = {
    "relu": lambda x: jnp.maximum(x, 0.0),
    "gelu": _gelu_tanh,
    "identity": lambda x: x,
}


def _projection_kernel(act_name, x_ref, w_ref, b_ref, o_ref):
    # x_ref: (B*T, H)   w_ref: (H, F)   b_ref: (1, F)   o_ref: (B*T, F)
    # Fused: matmul (MXU, f32 accumulate) + bias add + activation, one store.
    y = jnp.dot(x_ref[...], w_ref[...], preferred_element_type=jnp.float32)
    y = y + b_ref[...]
    o_ref[...] = _ACT2FN[act_name](y).astype(o_ref.dtype)


def neural_factors_projection(x, w_t, b, *, act=ACT):
    """x: (B, T, H) f32; w_t: (H, F) = torch Linear weight (F, H) transposed;
    b: (1, F).  Returns (B, T, F).  Dropout = eval-mode identity."""
    Bx, Tx, Hx = x.shape
    Fo = w_t.shape[1]
    # Flatten batch+time onto the sublane axis: one matmul covers everything.
    x2d = x.reshape(Bx * Tx, Hx)

    out2d = pl.pallas_call(
        functools.partial(_projection_kernel, act),
        out_shape=jax.ShapeDtypeStruct((Bx * Tx, Fo), jnp.float32),
        grid_spec=pltpu.PrefetchScalarGridSpec(
            num_scalar_prefetch=0,
            grid=(1,),                                         # single invocation
            in_specs=[
                pl.BlockSpec((Bx * Tx, Hx), lambda i: (0, 0)),  # x slab
                pl.BlockSpec((Hx, Fo), lambda i: (0, 0)),       # W^T
                pl.BlockSpec((1, Fo), lambda i: (0, 0)),        # bias
            ],
            out_specs=pl.BlockSpec((Bx * Tx, Fo), lambda i: (0, 0)),
        ),
        compiler_params=pltpu.CompilerParams(
            dimension_semantics=("arbitrary",)),
    )(x2d, w_t, b)
    return out2d.reshape(Bx, Tx, Fo)


# ---------------- pure-JAX reference (mirrors the PyTorch forward) ----------------
def reference(x, w_t, b, act=ACT):
    # dropout(eval) = identity; proj = Linear + ACT2FN[act]
    return _ACT2FN[act](x @ w_t + b)


def make_params(key):
    kw, kb = jax.random.split(key, 2)
    bound = 1.0 / math.sqrt(H)                       # default nn.Linear init
    # torch stores weight as (out, in); we pass W^T = (in, out).
    w_t = jax.random.uniform(kw, (H, F_OUT), jnp.float32, -bound, bound)
    b = jax.random.uniform(kb, (1, F_OUT), jnp.float32, -bound, bound)
    # (config.fixup_init would instead draw weight from U(-init_range, init_range)
    #  and zero the bias — an init-time choice, not a forward-pass difference.)
    return w_t, b


if __name__ == "__main__":
    key = jax.random.PRNGKey(0)
    kx, kp = jax.random.split(key, 2)

    x = jax.random.normal(kx, (B, T, H), jnp.float32)
    w_t, b = make_params(kp)

    out = neural_factors_projection(x, w_t, b)
    out = jax.block_until_ready(out)

    ref = reference(x, w_t, b)
    assert out.shape == (B, T, F_OUT)
    assert jnp.allclose(out, ref, atol=1e-5, rtol=1e-5), float(jnp.abs(out - ref).max())
    print("KERNEL_OK")
</pallas_src>

<mosaic_0001>
module attributes {stable_mosaic.version = 11 : i64} {
  func.func @_projection_kernel(%arg0: i32, %arg1: memref<16x32xf32, #tpu.memory_space<vmem>>, %arg2: memref<32x16xf32, #tpu.memory_space<vmem>>, %arg3: memref<1x16xf32, #tpu.memory_space<vmem>>, %arg4: memref<16x16xf32, #tpu.memory_space<vmem>>) attributes {dimension_semantics = [#tpu.dimension_semantics<arbitrary>], iteration_bounds = array<i64: 1>, scalar_prefetch = 0 : i64, scratch_operands = 0 : i64, tpu.core_type = #tpu.core_type<tc>, window_params = [{pipeline_mode = #tpu.pipeline_mode<synchronous>, transform_indices = @transform_0, window_bounds = array<i64: 16, 32>}, {pipeline_mode = #tpu.pipeline_mode<synchronous>, transform_indices = @transform_1, window_bounds = array<i64: 32, 16>}, {pipeline_mode = #tpu.pipeline_mode<synchronous>, transform_indices = @transform_2, window_bounds = array<i64: 1, 16>}, {pipeline_mode = #tpu.pipeline_mode<synchronous>, transform_indices = @transform_3, window_bounds = array<i64: 16, 16>}]} {
    %c0 = arith.constant 0 : index
    %c0_0 = arith.constant 0 : index
    %0 = vector.load %arg1[%c0, %c0_0] : memref<16x32xf32, #tpu.memory_space<vmem>>, vector<16x32xf32>
    %c0_1 = arith.constant 0 : index
    %c0_2 = arith.constant 0 : index
    %1 = vector.load %arg2[%c0_1, %c0_2] : memref<32x16xf32, #tpu.memory_space<vmem>>, vector<32x16xf32>
    %cst = arith.constant dense<0.000000e+00> : vector<16x16xf32>
    %2 = tpu.matmul %0, %1, %cst {dimension_numbers = #tpu.dot_dimension_numbers<[1], [0], [0], [1], [0, 0, 1, 1], [], []>} : vector<16x32xf32>, vector<32x16xf32>, vector<16x16xf32> -> vector<16x16xf32>
    %c0_3 = arith.constant 0 : index
    %c0_4 = arith.constant 0 : index
    %3 = vector.load %arg3[%c0_3, %c0_4] : memref<1x16xf32, #tpu.memory_space<vmem>>, vector<1x16xf32>
    %4 = vector.broadcast %3 : vector<1x16xf32> to vector<16x16xf32>
    %5 = arith.addf %2, %4 : vector<16x16xf32>
    %cst_5 = arith.constant 0.000000e+00 : f32
    %6 = vector.broadcast %cst_5 : f32 to vector<16x16xf32>
    %7 = arith.maximumf %5, %6 : vector<16x16xf32>
    %c0_6 = arith.constant 0 : index
    %c0_7 = arith.constant 0 : index
    %8 = vector.load %arg4[%c0_6, %c0_7] : memref<16x16xf32, #tpu.memory_space<vmem>>, vector<16x16xf32>
    tpu.vector_store %arg4[%c0_6, %c0_7], %7 {strides = array<i32>} : memref<16x16xf32, #tpu.memory_space<vmem>>, vector<16x16xf32>,
    return
  }
  func.func @transform_0(%arg0: i32) -> (i32, i32) {
    %c0_i32 = arith.constant 0 : i32
    %c0_i32_0 = arith.constant 0 : i32
    %c0_i32_1 = arith.constant 0 : i32
    return %c0_i32, %c0_i32_0 : i32, i32
  }
  func.func @transform_1(%arg0: i32) -> (i32, i32) {
    %c0_i32 = arith.constant 0 : i32
    %c0_i32_0 = arith.constant 0 : i32
    %c0_i32_1 = arith.constant 0 : i32
    return %c0_i32, %c0_i32_0 : i32, i32
  }
  func.func @transform_2(%arg0: i32) -> (i32, i32) {
    %c0_i32 = arith.constant 0 : i32
    %c0_i32_0 = arith.constant 0 : i32
    %c0_i32_1 = arith.constant 0 : i32
    return %c0_i32, %c0_i32_0 : i32, i32
  }
  func.func @transform_3(%arg0: i32) -> (i32, i32) {
    %c0_i32 = arith.constant 0 : i32
    %c0_i32_0 = arith.constant 0 : i32
    %c0_i32_1 = arith.constant 0 : i32
    return %c0_i32, %c0_i32_0 : i32, i32
  }
}

</mosaic_0001>

<bundles_post_ra>
// kernel: tpu_custom_call.1
= control target key start
LH: loop header
LB: loop body
LE: loop exit
PB: predicated region body
PF: predicated region fallthrough
CT: control target
= control target key end

     0   :  { %vm28_vm0 = vcmask 261120   ;;  %s242_s0 = inlined_call_operand.vmem [shape: f32[16,32], index: 0, kind: input, shape index: {}]   ;;  %s243_s1 = inlined_call_operand.vmem [shape: f32[32,16], index: 1, kind: input, shape index: {}]   ;;  %s244_s2 = inlined_call_operand.vmem [shape: f32[1,16], index: 2, kind: input, shape index: {}]   ;;  %s245_s3 = inlined_call_operand.hbm [shape: f32[16,16], index: 3, kind: output, shape index: {}]  }
   0x1   :  { %v17_v0 = vld [vmem:[%s243_s1] sm:$0xff]  ;;  %v18_v1 = vld [vmem:[%s243_s1 + $0x8] sm:$0xff]  ;;  %v19_v2 = vld [vmem:[%s243_s1 + $0x10] sm:$0xff] }
   0x2   :  { %v151_v3 = vpack.c.bf16 %v18_v1, %v17_v0  ;;  %v20_v4 = vld [vmem:[%s243_s1 + $0x18] sm:$0xff]  ;;  %v15_v5 = vld [vmem:[%s242_s0] sm:$0xff] }
   0x3   :  { %v155_v6 = vpack.c.bf16 %v20_v4, %v19_v2  ;;  %148 = vmatprep.mubr.msk.f32.mxu0 %vm28_vm0, %v15_v5 }
   0x4   :  { %8 = vsyncpa [#allocation3], 0  ;;  %152 = vmatprep.subr.bf16.mxu0 %v151_v3  ;;  %v16_v7 = vld [vmem:[%s242_s0 + $0x8] sm:$0xff]  ;;  %v131_v8 = vld [vmem:[%s244_s2] ss:$0 sm:$0xff]  ;;  %s186_s1 = smov [#allocation2]  }
   0x5   :  { %154 = vmatpush3.bf16.msra.mxu0 %v151_v3  ;;  %s120_s26 = sshll.u32 %s186_s1, 4  ;;  %vm112_vm1 = vcmask 130048   ;;  %s121_s26 = int_to_ptr.vmem [resolvable:$true] %s120_s26 }
   0x6   :  { %156 = vmatprep.subr.bf16.mxu0 %v155_v6  ;;  %s162_s27 = scalar_lea.vmem %s121_s26, 256  ;;  %p167_p1 = scmp.lt.s32.totalorder %s121_s26, %s121_s26 }
   0x7   :  { %p163_p0 = scmp.ne.s32.totalorder %s121_s26, %s162_s27  ;;  %p168_p2 = scmp.lt.s32.totalorder %s162_s27, %s162_s27 }
   0x9   :  { %158 = vmatpush3.bf16.msra.mxu0 %v155_v6  ;;  %p169_p3 = por %p168_p2, %p167_p1 }
   0xb   :  { %p170_p4 = pnand %p169_p3, %p163_p0 }
   0xc   :  { %149 = vmatmul.mubr.msk.f32.vlgmr.msra.gmra.mrb[0].mxu0 %vm28_vm0, %v16_v7 }
  0xdf   :  { %v150_v9 = vpop.f32.mrb[0].mxu0 }
  0xe0   :  { %v107_v10 = vadd.f32 %v150_v9, %v131_v8  ;;  %v101_v11 = vpop.f32.mrb[1].mxu0 }
  0xe1   :  { %v102_v12 = vadd.f32 %v131_v8, %v101_v11 }
  0xe2   :  { %v111_v13 = vmax.f32 %v107_v10, 0.0 }
  0xe3   :  { %v110_v14 = vmax.f32 %v102_v12, 0.0 }
  0xe4   :  { %114 = vst.msk [vmem:[#allocation2 + $0x8] sm:$0xff] %vm112_vm1, %v111_v13 }
  0xe5   :  { %113 = vst.msk [vmem:[#allocation2] sm:$0xff] %vm112_vm1, %v110_v14 }
  0xe6   :  { %173 = shalt.err (!%p170_p4)
}
  0xe7   :  { %s174_s28 = scalar_lea.hbm %s245_s3, 256 }
  0xe8   :  { %p175_p5 = scmp.ne.s32.totalorder %s245_s3, %s174_s28  ;;  %p178_p6 = scmp.lt.u32.totalorder %s174_s28, %s245_s3 }
  0xea   :  { %p180_p7 = pnand %p178_p6, %p175_p5 }
  0xec   :  { %183 = shalt.err (!%p180_p7)
}
  0xed   :  { %s187_s6 = smov 128   ;;  %s188_s7 = smov 8  }
  0xee   :  { %126 = dma.vmem_to_hbm [thread:$0]  %s121_s26, 256, %s245_s3, [#allocation3], %s187_s6, %s187_s6, %s188_s7  }
  0xef   :  { %184 = dma.done.wait [#allocation3], 256  }
  0xf0   :  { %185 = vsyncadd [#allocation3], 4294967040 }
  0xf1   :  { %130 = vsyncpa [#allocation3], 1 }

</bundles_post_ra>
